<compile_context>
chip_gen: v6e
topology: v6e:2x2x1
jax: 0.10.0
libtpu: 0.0.40
codegen_flags: <defaults>
</compile_context>

<pallas_src>
import jax
import jax.numpy as jnp
from jax.experimental import pallas as pl
from jax.experimental.pallas import tpu as pltpu


def _round_up(x, m):
    return ((x + m - 1) // m) * m


def _cdiv(a, b):
    return -(-a // b)


def _round_lanes(d):
    # 256-wide N keeps the 2x256x256 MXU (v6e/v7x) fully occupied; 128 is
    # already native on v5e and avoids doubling work for small dims.
    return _round_up(d, 256 if d > 128 else 128)


def _vmem_capacity_bytes(default=64 << 20):
    try:
        info = pltpu.get_tpu_info()
        cap = getattr(info, "vmem_capacity_bytes", None)
        if cap:
            return int(cap)
    except Exception:
        pass
    return default


# ---------------------------------------------------------------------------
# Kernel. Grid = (batch tiles, hidden-dim chunks). The hidden axis is a
# reduction for the second matmul: accumulate in f32 scratch, finalize with
# bias add + store (P3 pattern). ReLU per hidden chunk is exact.
#   x_ref:  (tb, Kp)   f32 input tile (cast to compute dtype in-kernel)
#   w1_ref: (Kp, th)   folded kron(U2,U1) @ core.T @ U3.T chunk (zero-padded)
#   w2_ref: (th, Op)   W_fc.T chunk (zero-padded)
#   b_ref:  (1, Op)    bias, f32
#   o_ref:  (tb, Op)   output tile
#   acc_ref:(tb, Op)   f32 accumulator scratch
# ---------------------------------------------------------------------------
def tucker_nn_kernel(x_ref, w1_ref, w2_ref, b_ref, o_ref, acc_ref):
    j = pl.program_id(1)

    @pl.when(j == 0)
    def _init():
        acc_ref[...] = jnp.zeros_like(acc_ref)

    x = x_ref[...].astype(w1_ref.dtype)            # in-kernel cast (VPU, free under MXU)
    h = jnp.dot(x, w1_ref[...], preferred_element_type=jnp.float32)
    h = jnp.maximum(h, 0.0)                        # ReLU in f32
    acc_ref[...] += jnp.dot(h.astype(w2_ref.dtype), w2_ref[...],
                            preferred_element_type=jnp.float32)

    @pl.when(j == pl.num_programs(1) - 1)
    def _finalize():
        o_ref[...] = (acc_ref[...] + b_ref[...]).astype(o_ref.dtype)


# ---------------------------------------------------------------------------
# One-time parameter preparation (hoisted out of the per-call forward path).
# ---------------------------------------------------------------------------
def prepare_params(params, input_shape, compute_dtype=jnp.float32):
    I0, I1 = input_shape
    K = I0 * I1

    # Fold the entire pre-ReLU chain into a single (K, H) matrix (exact in f32).
    # TODO(synk): for very large I0,I1,r1,r2 replace the one-time kron
    # materialization with two mode-wise contractions folded into W1.
    kron_prod = jnp.kron(params["U2"], params["U1"])            # (I1*I0, r1*r2)
    W1 = kron_prod @ params["core"].T @ params["U3"].T          # (K, H)
    W2 = params["W_fc"].T                                       # (H, O)
    b = params["b_fc"].reshape(1, -1)                           # (1, O)

    H, O = W2.shape
    Kp = _round_up(K, 128)
    Hp = _round_lanes(H)
    Op = _round_lanes(O)

    # Zero-pad to lane-dense shapes (numerically exact: padded rows/cols are 0).
    W1p = jnp.zeros((Kp, Hp), jnp.float32).at[:K, :H].set(W1)
    W2p = jnp.zeros((Hp, Op), jnp.float32).at[:H, :O].set(W2)
    bp = jnp.zeros((1, Op), jnp.float32).at[:, :O].set(b)

    return {
        "W1": W1p.astype(compute_dtype),
        "W2": W2p.astype(compute_dtype),
        "b": bp,                                    # bias stays f32
        "K": K, "Kp": Kp, "H": H, "O": O,
        "compute_dtype": jnp.dtype(compute_dtype),
    }


def _vmem_bytes(tb, Kp, th, Op, cd_size, out_size, n_h):
    w_buf = 1 if n_h == 1 else 2                    # single-buffer resident weights
    return (2 * tb * Kp * 4                         # x tile, f32, double-buffered
            + w_buf * Kp * th * cd_size             # W1 chunk
            + w_buf * th * Op * cd_size             # W2 chunk
            + Op * 4                                # bias, single-buffered
            + tb * Op * 4                           # f32 accumulator scratch
            + 2 * tb * Op * out_size)               # output tile, double-buffered


def _choose_h_tile(Hp, Kp, Op, tb, cd_size, out_size, budget):
    cands = [d for d in range(128, Hp + 1, 128) if Hp % d == 0]
    for th in sorted(cands, reverse=True):
        n_h = Hp // th
        if _vmem_bytes(tb, Kp, th, Op, cd_size, out_size, n_h) <= budget:
            return th, n_h
    return 128, Hp // 128


# ---------------------------------------------------------------------------
# Forward: lane-pad K, grid over (batch, hidden chunks), slice output.
# ---------------------------------------------------------------------------
def tucker_nn_forward(x, prepared, *, batch_tile=256, out_dtype=jnp.float32):
    B = x.shape[0]
    K, Kp = prepared["K"], prepared["Kp"]
    cd = prepared["compute_dtype"]
    W1, W2, b = prepared["W1"], prepared["W2"], prepared["b"]
    Hp, Op = W2.shape

    x_flat = x.reshape(B, K)                        # stays f32; cast happens in-kernel

    sub = 8                                         # f32 sublane quantum
    Bp0 = _round_up(B, sub)

    # Per-generation VMEM budget (default scoped limit is only 16/32 MiB).
    vmem_cap = _vmem_capacity_bytes()
    vmem_limit = int(vmem_cap * 0.8)
    budget = vmem_limit - (2 << 20)

    cd_size = cd.itemsize
    out_size = jnp.dtype(out_dtype).itemsize

    # Batch tiling: >= 2 grid steps whenever possible (keeps v7x's 2nd TC busy),
    # padding bounded by ~one sublane group per tile instead of a full tile.
    n_b = max(1, _cdiv(Bp0, batch_tile))
    if Bp0 >= 2 * sub:
        n_b = max(n_b, 2)
    tb = _round_up(_cdiv(Bp0, n_b), sub)

    # Hidden-dim chunking so resident weights + tiles fit the VMEM budget.
    th, n_h = _choose_h_tile(Hp, Kp, Op, tb, cd_size, out_size, budget)
    while tb > sub and _vmem_bytes(tb, Kp, th, Op, cd_size, out_size, n_h) > budget:
        tb = max(sub, _round_up(tb // 2, sub))
        th, n_h = _choose_h_tile(Hp, Kp, Op, tb, cd_size, out_size, budget)

    n_b = _cdiv(Bp0, tb)
    Bp = n_b * tb

    if Bp != B or Kp != K:
        x_flat = jnp.pad(x_flat, ((0, Bp - B), (0, Kp - K)))

    cost = pl.CostEstimate(
        flops=int(2 * Bp * (Kp * Hp + Hp * Op)),
        transcendentals=0,
        bytes_accessed=int(Bp * Kp * 4 + Kp * Hp * cd_size + Hp * Op * cd_size
                           + Op * 4 + Bp * Op * out_size),
    )

    def _call(use_single_buffer):
        def _wspec(shape, index_map, want_single):
            if use_single_buffer and want_single:
                return pl.BlockSpec(shape, index_map, pipeline_mode=pl.Buffered(1))
            return pl.BlockSpec(shape, index_map)

        in_specs = [
            pl.BlockSpec((tb, Kp), lambda i, j: (i, 0)),          # x: tiled over batch
            _wspec((Kp, th), lambda i, j: (0, j), n_h == 1),      # W1 chunk (resident if n_h==1)
            _wspec((th, Op), lambda i, j: (j, 0), n_h == 1),      # W2 chunk
            _wspec((1, Op), lambda i, j: (0, 0), True),           # bias: always resident
        ]
        return pl.pallas_call(
            tucker_nn_kernel,
            out_shape=jax.ShapeDtypeStruct((Bp, Op), out_dtype),
            grid=(n_b, n_h),
            in_specs=in_specs,
            out_specs=pl.BlockSpec((tb, Op), lambda i, j: (i, 0)),
            scratch_shapes=[pltpu.VMEM((tb, Op), jnp.float32)],
            compiler_params=pltpu.CompilerParams(
                dimension_semantics=("parallel", "arbitrary"),
                vmem_limit_bytes=int(vmem_limit),
            ),
            cost_estimate=cost,
        )(x_flat, W1, W2, b)

    try:
        out = _call(True)
    except Exception:
        # Defensive fallback if this JAX build rejects single-buffered specs.
        out = _call(False)

    return out[:B, : prepared["O"]]


# ---------------------------------------------------------------------------
# Parameter init + pure-JAX reference mirroring the PyTorch module exactly.
# ---------------------------------------------------------------------------
def init_params(key, input_shape, hidden_dim, output_dim, ranks):
    I0, I1 = input_shape
    r0, r1, r2 = ranks
    k1, k2, k3, k4, k5, k6 = jax.random.split(key, 6)
    return {
        "U3": jax.random.normal(k1, (hidden_dim, r0), jnp.float32)
        / jnp.sqrt(float(hidden_dim)),
        "core": jax.random.normal(k2, (r0, r1 * r2), jnp.float32)
        / jnp.sqrt(float(r0 * r1 * r2)),
        "U2": jax.random.normal(k3, (I1, r1), jnp.float32) / jnp.sqrt(float(I1)),
        "U1": jax.random.normal(k4, (I0, r2), jnp.float32) / jnp.sqrt(float(I0)),
        "W_fc": jax.random.normal(k5, (output_dim, hidden_dim), jnp.float32)
        / jnp.sqrt(float(hidden_dim)),
        "b_fc": 0.01 * jax.random.normal(k6, (output_dim,), jnp.float32),
    }


def reference_forward(x, params):
    B = x.shape[0]
    x_flat = x.reshape(B, -1)
    kron_prod = jnp.kron(params["U2"], params["U1"])
    t = x_flat @ kron_prod
    t = t @ params["core"].T
    t = t @ params["U3"].T
    t = jnp.maximum(t, 0.0)
    return t @ params["W_fc"].T + params["b_fc"]


if __name__ == "__main__":
    key = jax.random.PRNGKey(0)

    # --- Test 1: toy shapes matching the module defaults -------------------
    batch, input_shape, hidden_dim, output_dim, ranks = 2, (4, 8), 32, 8, [10, 5, 5]
    kx, kp, key = jax.random.split(key, 3)
    x = jax.random.normal(kx, (batch, input_shape[0], input_shape[1]), jnp.float32)
    params = init_params(kp, input_shape, hidden_dim, output_dim, ranks)
    ref = reference_forward(x, params)

    prep_f32 = prepare_params(params, input_shape, compute_dtype=jnp.float32)
    out_f32 = jax.block_until_ready(tucker_nn_forward(x, prep_f32))
    assert out_f32.shape == (batch, output_dim)
    assert jnp.allclose(out_f32, ref, atol=1e-4, rtol=1e-4), "f32 mismatch (toy)"

    prep_bf16 = prepare_params(params, input_shape, compute_dtype=jnp.bfloat16)
    out_bf16 = jax.block_until_ready(tucker_nn_forward(x, prep_bf16))
    assert jnp.allclose(out_bf16, ref, atol=3e-2, rtol=3e-2), "bf16 mismatch (toy)"

    # --- Test 2: awkward batch + larger dims (exercises multi-tile batch,
    #             256-lane padding, bounded batch padding) -------------------
    batch2, input_shape2, hidden2, out2 = 300, (12, 16), 384, 200
    kx2, kp2, key = jax.random.split(key, 3)
    x2 = jax.random.normal(kx2, (batch2, input_shape2[0], input_shape2[1]), jnp.float32)
    params2 = init_params(kp2, input_shape2, hidden2, out2, ranks)
    ref2 = reference_forward(x2, params2)

    prep2_f32 = prepare_params(params2, input_shape2, compute_dtype=jnp.float32)
    out2_f32 = jax.block_until_ready(tucker_nn_forward(x2, prep2_f32))
    assert out2_f32.shape == (batch2, out2)
    assert jnp.allclose(out2_f32, ref2, atol=1e-3, rtol=1e-3), "f32 mismatch (large)"

    prep2_bf16 = prepare_params(params2, input_shape2, compute_dtype=jnp.bfloat16)
    out2_bf16 = jax.block_until_ready(tucker_nn_forward(x2, prep2_bf16))
    assert jnp.allclose(out2_bf16, ref2, atol=5e-2, rtol=5e-2), "bf16 mismatch (large)"

    print("KERNEL_OK")
</pallas_src>

<mosaic_0001>
module attributes {stable_mosaic.version = 11 : i64} {
  func.func @tucker_nn_kernel(%arg0: i32, %arg1: i32, %arg2: memref<8x128xf32, #tpu.memory_space<vmem>>, %arg3: memref<128x128xf32, #tpu.memory_space<vmem>>, %arg4: memref<128x128xf32, #tpu.memory_space<vmem>>, %arg5: memref<1x128xf32, #tpu.memory_space<vmem>>, %arg6: memref<8x128xf32, #tpu.memory_space<vmem>>, %arg7: memref<8x128xf32, #tpu.memory_space<vmem>>) attributes {dimension_semantics = [#tpu.dimension_semantics<parallel>, #tpu.dimension_semantics<arbitrary>], iteration_bounds = array<i64: 1, 1>, scalar_prefetch = 0 : i64, scratch_operands = 1 : i64, tpu.core_type = #tpu.core_type<tc>, window_params = [{transform_indices = @transform_0, window_bounds = array<i64: 8, 128>}, {pipeline_mode = #tpu.pipeline_mode<synchronous>, transform_indices = @transform_1, window_bounds = array<i64: 128, 128>}, {pipeline_mode = #tpu.pipeline_mode<synchronous>, transform_indices = @transform_2, window_bounds = array<i64: 128, 128>}, {pipeline_mode = #tpu.pipeline_mode<synchronous>, transform_indices = @transform_3, window_bounds = array<i64: 1, 128>}, {transform_indices = @transform_4, window_bounds = array<i64: 8, 128>}]} {
    %c0_i32 = arith.constant 0 : i32
    %0 = arith.cmpi eq, %arg1, %c0_i32 : i32
    %1 = arith.extui %0 : i1 to i32
    %c0_i32_0 = arith.constant 0 : i32
    %2 = arith.cmpi ne, %1, %c0_i32_0 : i32
    scf.if %2 {
      %cst_14 = arith.constant 0.000000e+00 : f32
      %16 = vector.broadcast %cst_14 : f32 to vector<8x128xf32>
      %c0_15 = arith.constant 0 : index
      %c0_16 = arith.constant 0 : index
      %17 = vector.load %arg7[%c0_15, %c0_16] : memref<8x128xf32, #tpu.memory_space<vmem>>, vector<8x128xf32>
      tpu.vector_store %arg7[%c0_15, %c0_16], %16 {strides = array<i32>} : memref<8x128xf32, #tpu.memory_space<vmem>>, vector<8x128xf32>,
    } else {
    }
    %c0 = arith.constant 0 : index
    %c0_1 = arith.constant 0 : index
    %3 = vector.load %arg2[%c0, %c0_1] : memref<8x128xf32, #tpu.memory_space<vmem>>, vector<8x128xf32>
    %c0_2 = arith.constant 0 : index
    %c0_3 = arith.constant 0 : index
    %4 = vector.load %arg3[%c0_2, %c0_3] : memref<128x128xf32, #tpu.memory_space<vmem>>, vector<128x128xf32>
    %cst = arith.constant dense<0.000000e+00> : vector<8x128xf32>
    %5 = tpu.matmul %3, %4, %cst {dimension_numbers = #tpu.dot_dimension_numbers<[1], [0], [0], [1], [0, 0, 1, 1], [], []>} : vector<8x128xf32>, vector<128x128xf32>, vector<8x128xf32> -> vector<8x128xf32>
    %cst_4 = arith.constant 0.000000e+00 : f32
    %6 = vector.broadcast %cst_4 : f32 to vector<8x128xf32>
    %7 = arith.maximumf %5, %6 : vector<8x128xf32>
    %c0_5 = arith.constant 0 : index
    %c0_6 = arith.constant 0 : index
    %8 = vector.load %arg7[%c0_5, %c0_6] : memref<8x128xf32, #tpu.memory_space<vmem>>, vector<8x128xf32>
    %c0_7 = arith.constant 0 : index
    %c0_8 = arith.constant 0 : index
    %9 = vector.load %arg4[%c0_7, %c0_8] : memref<128x128xf32, #tpu.memory_space<vmem>>, vector<128x128xf32>
    %cst_9 = arith.constant dense<0.000000e+00> : vector<8x128xf32>
    %10 = tpu.matmul %7, %9, %cst_9 {dimension_numbers = #tpu.dot_dimension_numbers<[1], [0], [0], [1], [0, 0, 1, 1], [], []>} : vector<8x128xf32>, vector<128x128xf32>, vector<8x128xf32> -> vector<8x128xf32>
    %11 = arith.addf %8, %10 : vector<8x128xf32>
    %c0_10 = arith.constant 0 : index
    %c0_11 = arith.constant 0 : index
    %12 = vector.load %arg7[%c0_10, %c0_11] : memref<8x128xf32, #tpu.memory_space<vmem>>, vector<8x128xf32>
    tpu.vector_store %arg7[%c0_10, %c0_11], %11 {strides = array<i32>} : memref<8x128xf32, #tpu.memory_space<vmem>>, vector<8x128xf32>,
    %c0_i32_12 = arith.constant 0 : i32
    %13 = arith.cmpi eq, %arg1, %c0_i32_12 : i32
    %14 = arith.extui %13 : i1 to i32
    %c0_i32_13 = arith.constant 0 : i32
    %15 = arith.cmpi ne, %14, %c0_i32_13 : i32
    scf.if %15 {
      %c0_14 = arith.constant 0 : index
      %c0_15 = arith.constant 0 : index
      %16 = vector.load %arg7[%c0_14, %c0_15] : memref<8x128xf32, #tpu.memory_space<vmem>>, vector<8x128xf32>
      %c0_16 = arith.constant 0 : index
      %c0_17 = arith.constant 0 : index
      %17 = vector.load %arg5[%c0_16, %c0_17] : memref<1x128xf32, #tpu.memory_space<vmem>>, vector<1x128xf32>
      %18 = vector.broadcast %17 : vector<1x128xf32> to vector<8x128xf32>
      %19 = arith.addf %16, %18 : vector<8x128xf32>
      %c0_18 = arith.constant 0 : index
      %c0_19 = arith.constant 0 : index
      %20 = vector.load %arg6[%c0_18, %c0_19] : memref<8x128xf32, #tpu.memory_space<vmem>>, vector<8x128xf32>
      tpu.vector_store %arg6[%c0_18, %c0_19], %19 {strides = array<i32>} : memref<8x128xf32, #tpu.memory_space<vmem>>, vector<8x128xf32>,
    } else {
    }
    return
  }
  func.func @transform_0(%arg0: i32, %arg1: i32) -> (i32, i32) {
    %c0_i32 = arith.constant 0 : i32
    %c0_i32_0 = arith.constant 0 : i32
    return %arg0, %c0_i32 : i32, i32
  }
  func.func @transform_1(%arg0: i32, %arg1: i32) -> (i32, i32) {
    %c0_i32 = arith.constant 0 : i32
    %c0_i32_0 = arith.constant 0 : i32
    return %c0_i32, %arg1 : i32, i32
  }
  func.func @transform_2(%arg0: i32, %arg1: i32) -> (i32, i32) {
    %c0_i32 = arith.constant 0 : i32
    %c0_i32_0 = arith.constant 0 : i32
    return %arg1, %c0_i32 : i32, i32
  }
  func.func @transform_3(%arg0: i32, %arg1: i32) -> (i32, i32) {
    %c0_i32 = arith.constant 0 : i32
    %c0_i32_0 = arith.constant 0 : i32
    %c0_i32_1 = arith.constant 0 : i32
    return %c0_i32, %c0_i32_0 : i32, i32
  }
  func.func @transform_4(%arg0: i32, %arg1: i32) -> (i32, i32) {
    %c0_i32 = arith.constant 0 : i32
    %c0_i32_0 = arith.constant 0 : i32
    return %arg0, %c0_i32 : i32, i32
  }
}

module attributes {stable_mosaic.version = 11 : i64} {
  func.func @tucker_nn_kernel(%arg0: i32, %arg1: i32, %arg2: memref<8x128xf32, #tpu.memory_space<vmem>>, %arg3: memref<128x128xf32, #tpu.memory_space<vmem>>, %arg4: memref<128x128xf32, #tpu.memory_space<vmem>>, %arg5: memref<1x128xf32, #tpu.memory_space<vmem>>, %arg6: memref<8x128xf32, #tpu.memory_space<vmem>>, %arg7: memref<8x128xf32, #tpu.memory_space<vmem>>) attributes {dimension_semantics = [#tpu.dimension_semantics<parallel>, #tpu.dimension_semantics<arbitrary>], iteration_bounds = array<i64: 1, 1>, scalar_prefetch = 0 : i64, scratch_operands = 1 : i64, tpu.core_type = #tpu.core_type<tc>, window_params = [{transform_indices = @transform_0, window_bounds = array<i64: 8, 128>}, {transform_indices = @transform_1, window_bounds = array<i64: 128, 128>}, {transform_indices = @transform_2, window_bounds = array<i64: 128, 128>}, {pipeline_mode = #tpu.pipeline_mode<synchronous>, transform_indices = @transform_3, window_bounds = array<i64: 1, 128>}, {transform_indices = @transform_4, window_bounds = array<i64: 8, 128>}]} {
    %c0_i32 = arith.constant 0 : i32
    %0 = arith.cmpi eq, %arg1, %c0_i32 : i32
    %1 = arith.extui %0 : i1 to i32
    %c0_i32_0 = arith.constant 0 : i32
    %2 = arith.cmpi ne, %1, %c0_i32_0 : i32
    scf.if %2 {
      %cst_14 = arith.constant 0.000000e+00 : f32
      %16 = vector.broadcast %cst_14 : f32 to vector<8x128xf32>
      %c0_15 = arith.constant 0 : index
      %c0_16 = arith.constant 0 : index
      %17 = vector.load %arg7[%c0_15, %c0_16] : memref<8x128xf32, #tpu.memory_space<vmem>>, vector<8x128xf32>
      tpu.vector_store %arg7[%c0_15, %c0_16], %16 {strides = array<i32>} : memref<8x128xf32, #tpu.memory_space<vmem>>, vector<8x128xf32>,
    } else {
    }
    %c0 = arith.constant 0 : index
    %c0_1 = arith.constant 0 : index
    %3 = vector.load %arg2[%c0, %c0_1] : memref<8x128xf32, #tpu.memory_space<vmem>>, vector<8x128xf32>
    %c0_2 = arith.constant 0 : index
    %c0_3 = arith.constant 0 : index
    %4 = vector.load %arg3[%c0_2, %c0_3] : memref<128x128xf32, #tpu.memory_space<vmem>>, vector<128x128xf32>
    %cst = arith.constant dense<0.000000e+00> : vector<8x128xf32>
    %5 = tpu.matmul %3, %4, %cst {dimension_numbers = #tpu.dot_dimension_numbers<[1], [0], [0], [1], [0, 0, 1, 1], [], []>} : vector<8x128xf32>, vector<128x128xf32>, vector<8x128xf32> -> vector<8x128xf32>
    %cst_4 = arith.constant 0.000000e+00 : f32
    %6 = vector.broadcast %cst_4 : f32 to vector<8x128xf32>
    %7 = arith.maximumf %5, %6 : vector<8x128xf32>
    %c0_5 = arith.constant 0 : index
    %c0_6 = arith.constant 0 : index
    %8 = vector.load %arg7[%c0_5, %c0_6] : memref<8x128xf32, #tpu.memory_space<vmem>>, vector<8x128xf32>
    %c0_7 = arith.constant 0 : index
    %c0_8 = arith.constant 0 : index
    %9 = vector.load %arg4[%c0_7, %c0_8] : memref<128x128xf32, #tpu.memory_space<vmem>>, vector<128x128xf32>
    %cst_9 = arith.constant dense<0.000000e+00> : vector<8x128xf32>
    %10 = tpu.matmul %7, %9, %cst_9 {dimension_numbers = #tpu.dot_dimension_numbers<[1], [0], [0], [1], [0, 0, 1, 1], [], []>} : vector<8x128xf32>, vector<128x128xf32>, vector<8x128xf32> -> vector<8x128xf32>
    %11 = arith.addf %8, %10 : vector<8x128xf32>
    %c0_10 = arith.constant 0 : index
    %c0_11 = arith.constant 0 : index
    %12 = vector.load %arg7[%c0_10, %c0_11] : memref<8x128xf32, #tpu.memory_space<vmem>>, vector<8x128xf32>
    tpu.vector_store %arg7[%c0_10, %c0_11], %11 {strides = array<i32>} : memref<8x128xf32, #tpu.memory_space<vmem>>, vector<8x128xf32>,
    %c0_i32_12 = arith.constant 0 : i32
    %13 = arith.cmpi eq, %arg1, %c0_i32_12 : i32
    %14 = arith.extui %13 : i1 to i32
    %c0_i32_13 = arith.constant 0 : i32
    %15 = arith.cmpi ne, %14, %c0_i32_13 : i32
    scf.if %15 {
      %c0_14 = arith.constant 0 : index
      %c0_15 = arith.constant 0 : index
      %16 = vector.load %arg7[%c0_14, %c0_15] : memref<8x128xf32, #tpu.memory_space<vmem>>, vector<8x128xf32>
      %c0_16 = arith.constant 0 : index
      %c0_17 = arith.constant 0 : index
      %17 = vector.load %arg5[%c0_16, %c0_17] : memref<1x128xf32, #tpu.memory_space<vmem>>, vector<1x128xf32>
      %18 = vector.broadcast %17 : vector<1x128xf32> to vector<8x128xf32>
      %19 = arith.addf %16, %18 : vector<8x128xf32>
      %c0_18 = arith.constant 0 : index
      %c0_19 = arith.constant 0 : index
      %20 = vector.load %arg6[%c0_18, %c0_19] : memref<8x128xf32, #tpu.memory_space<vmem>>, vector<8x128xf32>
      tpu.vector_store %arg6[%c0_18, %c0_19], %19 {strides = array<i32>} : memref<8x128xf32, #tpu.memory_space<vmem>>, vector<8x128xf32>,
    } else {
    }
    return
  }
  func.func @transform_0(%arg0: i32, %arg1: i32) -> (i32, i32) {
    %c0_i32 = arith.constant 0 : i32
    %c0_i32_0 = arith.constant 0 : i32
    return %arg0, %c0_i32 : i32, i32
  }
  func.func @transform_1(%arg0: i32, %arg1: i32) -> (i32, i32) {
    %c0_i32 = arith.constant 0 : i32
    %c0_i32_0 = arith.constant 0 : i32
    return %c0_i32, %arg1 : i32, i32
  }
  func.func @transform_2(%arg0: i32, %arg1: i32) -> (i32, i32) {
    %c0_i32 = arith.constant 0 : i32
    %c0_i32_0 = arith.constant 0 : i32
    return %arg1, %c0_i32 : i32, i32
  }
  func.func @transform_3(%arg0: i32, %arg1: i32) -> (i32, i32) {
    %c0_i32 = arith.constant 0 : i32
    %c0_i32_0 = arith.constant 0 : i32
    %c0_i32_1 = arith.constant 0 : i32
    return %c0_i32, %c0_i32_0 : i32, i32
  }
  func.func @transform_4(%arg0: i32, %arg1: i32) -> (i32, i32) {
    %c0_i32 = arith.constant 0 : i32
    %c0_i32_0 = arith.constant 0 : i32
    return %arg0, %c0_i32 : i32, i32
  }
}

</mosaic_0001>

<bundles_post_ra>
// kernel: tpu_custom_call.1
= control target key start
LH: loop header
LB: loop body
LE: loop exit
PB: predicated region body
PF: predicated region fallthrough
CT: control target
= control target key end

     0   :  { %9 = vsyncpa [#allocation4], 0  ;;  %s549_s0 = inlined_call_operand.hbm [shape: f32[8,128], index: 0, kind: input, shape index: {}]   ;;  %s550_s1 = inlined_call_operand.hbm [shape: f32[128,128], index: 1, kind: input, shape index: {}]   ;;  %s551_s2 = inlined_call_operand.hbm [shape: f32[128,128], index: 2, kind: input, shape index: {}]   ;;  %s552_s3 = inlined_call_operand.vmem [shape: f32[1,128], index: 3, kind: input, shape index: {}]   ;;  %s553_s4 = inlined_call_operand.hbm [shape: f32[8,128], index: 4, kind: output, shape index: {}]  }
   0x1   :  { %10 = vsyncpa [#allocation7], 0 }
   0x2   :  { %11 = vsyncpa [#allocation5], 0  ;;  %s467_s15 = smov [#allocation6]  }
   0x3   :  { %s27_s16 = sshll.u32 %s467_s15, 4  ;;  %s28_s16 = int_to_ptr.vmem [resolvable:$true] %s27_s16 }
   0x4   :  { %s389_s17 = scalar_lea.vmem %s28_s16, 2048  ;;  %p394_p1 = scmp.lt.s32.totalorder %s28_s16, %s28_s16 }
   0x5   :  { %p390_p0 = scmp.ne.s32.totalorder %s28_s16, %s389_s17  ;;  %p395_p2 = scmp.lt.s32.totalorder %s389_s17, %s389_s17 }
   0x7   :  { %p396_p3 = por %p395_p2, %p394_p1 }
   0x9   :  { %p397_p4 = pnand %p396_p3, %p390_p0 }
   0xb   :  { %400 = shalt.err (!%p397_p4)
}
   0xc   :  { %s468_s18 = smov 128   ;;  %s469_s19 = smov 8  }
   0xd   :  { %33 = dma.hbm_to_vmem [thread:$0]  %s550_s1, 2048, %s28_s16, [#allocation7], %s468_s18, %s468_s18, %s469_s19  }
   0xe   :  { %s470_s22 = smov [#allocation3]   ;;  %s471_s24 = smov [#allocation8]  }
   0xf   :  { %s18_s23 = sshll.u32 %s470_s22, 4  ;;  %s39_s25 = sshll.u32 %s471_s24, 4  ;;  %s19_s23 = int_to_ptr.vmem [resolvable:$true] %s18_s23  ;;  %s40_s25 = int_to_ptr.vmem [resolvable:$true] %s39_s25 }
  0x10   :  { %s409_s26 = scalar_lea.vmem %s19_s23, 128  ;;  %p414_p6 = scmp.lt.s32.totalorder %s19_s23, %s19_s23 }
  0x11   :  { %p410_p5 = scmp.ne.s32.totalorder %s19_s23, %s409_s26  ;;  %p415_p7 = scmp.lt.s32.totalorder %s409_s26, %s409_s26 }
  0x13   :  { %p416_p8 = por %p415_p7, %p414_p6 }
  0x15   :  { %p417_p9 = pnand %p416_p8, %p410_p5 }
  0x17   :  { %420 = shalt.err (!%p417_p9)
}
  0x18   :  { %21 = dma.hbm_to_vmem [thread:$0]  %s549_s0, 128, %s19_s23, [#allocation4]  }
  0x19   :  { %s429_s29 = scalar_lea.vmem %s40_s25, 2048  ;;  %p434_p11 = scmp.lt.s32.totalorder %s40_s25, %s40_s25 }
  0x1a   :  { %p430_p10 = scmp.ne.s32.totalorder %s40_s25, %s429_s29  ;;  %p435_p12 = scmp.lt.s32.totalorder %s429_s29, %s429_s29 }
  0x1c   :  { %p436_p13 = por %p435_p12, %p434_p11 }
  0x1e   :  { %p437_p0 = pnand %p436_p13, %p430_p10 }
  0x20   :  { %440 = shalt.err (!%p437_p0)
}
  0x21   :  { %45 = dma.hbm_to_vmem [thread:$0]  %s551_s2, 2048, %s40_s25, [#allocation7], %s468_s18, %s468_s18, %s469_s19  }
  0x22   :  { %461 = dma.done.wait [#allocation4], 128  }
  0x23   :  { %462 = vsyncadd [#allocation4], 4294967168 }
  0x24   :  { %463 = dma.done.wait [#allocation7], 4096  }
  0x25   :  { %464 = vsyncadd [#allocation7], 4294963200  ;;  %v472_v0 = vmov 0.0   ;;  %vm473_vm0 = vmmov 0   ;;  %v78_v1 = vld [vmem:[#allocation6 + $0x78] sm:$0xff]  ;;  %v77_v2 = vld [vmem:[#allocation6 + $0x70] sm:$0xff] }
  0x26   :  { %303 = vmatprep.subr.mxu0 %v472_v0  ;;  %335 = vmatprep.mubr.msk.f32.mxu0 %vm473_vm0, %v472_v0  ;;  %v76_v3 = vld [vmem:[#allocation6 + $0x68] sm:$0xff]  ;;  %v75_v4 = vld [vmem:[#allocation6 + $0x60] sm:$0xff]  ;;  %v166_v5 = vld [vmem:[#allocation8 + $0x78] sm:$0xff]  ;;  %s474_s5 = smov [#allocation9]  }
  0x27   :  { %338 = vmatprep.subr.mxu1 %v472_v0  ;;  %370 = vmatprep.mubr.msk.f32.mxu1 %vm473_vm0, %v472_v0  ;;  %v74_v6 = vld [vmem:[#allocation6 + $0x58] sm:$0xff]  ;;  %v165_v7 = vld [vmem:[#allocation8 + $0x70] sm:$0xff]  ;;  %v164_v8 = vld [vmem:[#allocation8 + $0x68] sm:$0xff]  ;;  %s258_s6 = sshll.u32 %s474_s5, 4  ;;  %s259_s6 = int_to_ptr.vmem [resolvable:$true] %s258_s6 }
  0x28   :  { %304 = vmatpush3.msra.mxu0 %v78_v1  ;;  %339 = vmatpush3.msra.mxu1 %v166_v5  ;;  %v73_v9 = vld [vmem:[#allocation6 + $0x50] sm:$0xff]  ;;  %v163_v10 = vld [vmem:[#allocation8 + $0x60] sm:$0xff]  ;;  %v72_v11 = vld [vmem:[#allocation6 + $0x48] sm:$0xff]  ;;  %s441_s7 = scalar_lea.vmem %s259_s6, 128  ;;  %p446_p2 = scmp.lt.s32.totalorder %s259_s6, %s259_s6 }
  0x29   :  { %305 = vmatprep.subr.mxu0 %v472_v0  ;;  %340 = vmatprep.subr.mxu1 %v472_v0  ;;  %v162_v12 = vld [vmem:[#allocation8 + $0x58] sm:$0xff]  ;;  %v71_v13 = vld [vmem:[#allocation6 + $0x40] sm:$0xff]  ;;  %v161_v14 = vld [vmem:[#allocation8 + $0x50] sm:$0xff]  ;;  %p442_p1 = scmp.ne.s32.totalorder %s259_s6, %s441_s7  ;;  %p447_p3 = scmp.lt.s32.totalorder %s441_s7, %s441_s7 }
  0x2a   :  { %306 = vmatpush3.msra.mxu0 %v77_v2  ;;  %341 = vmatpush3.msra.mxu1 %v165_v7  ;;  %v70_v15 = vld [vmem:[#allocation6 + $0x38] sm:$0xff]  ;;  %v160_v16 = vld [vmem:[#allocation8 + $0x48] sm:$0xff]  ;;  %v69_v17 = vld [vmem:[#allocation6 + $0x30] sm:$0xff] }
  0x2b   :  { %307 = vmatprep.subr.mxu0 %v472_v0  ;;  %342 = vmatprep.subr.mxu1 %v472_v0  ;;  %v159_v18 = vld [vmem:[#allocation8 + $0x40] sm:$0xff]  ;;  %v68_v19 = vld [vmem:[#allocation6 + $0x28] sm:$0xff]  ;;  %v158_v20 = vld [vmem:[#allocation8 + $0x38] sm:$0xff]  ;;  %p448_p4 = por %p447_p3, %p446_p2 }
  0x2c   :  { %308 = vmatpush3.msra.mxu0 %v76_v3  ;;  %343 = vmatpush3.msra.mxu1 %v164_v8  ;;  %v67_v21 = vld [vmem:[#allocation6 + $0x20] sm:$0xff]  ;;  %v157_v22 = vld [vmem:[#allocation8 + $0x30] sm:$0xff]  ;;  %v66_v23 = vld [vmem:[#allocation6 + $0x18] sm:$0xff] }
  0x2d   :  { %309 = vmatprep.subr.mxu0 %v472_v0  ;;  %344 = vmatprep.subr.mxu1 %v472_v0  ;;  %v156_v24 = vld [vmem:[#allocation8 + $0x28] sm:$0xff]  ;;  %v65_v25 = vld [vmem:[#allocation6 + $0x10] sm:$0xff]  ;;  %v155_v26 = vld [vmem:[#allocation8 + $0x20] sm:$0xff]  ;;  %p449_p5 = pnand %p448_p4, %p442_p1 }
  0x2e   :  { %310 = vmatpush3.msra.mxu0 %v75_v4  ;;  %345 = vmatpush3.msra.mxu1 %v163_v10  ;;  %v64_v27 = vld [vmem:[#allocation6 + $0x8] sm:$0xff]  ;;  %v154_v28 = vld [vmem:[#allocation8 + $0x18] sm:$0xff]  ;;  %v63_v29 = vld [vmem:[#allocation6] sm:$0xff] }
  0x2f   :  { %311 = vmatprep.subr.mxu0 %v472_v0  ;;  %346 = vmatprep.subr.mxu1 %v472_v0  ;;  %v62_v30 = vld [vmem:[#allocation3] sm:$0xff]  ;;  %v153_v31 = vld [vmem:[#allocation8 + $0x10] sm:$0xff]  ;;  %v152_v32 = vld [vmem:[#allocation8 + $0x8] sm:$0xff] }
  0x30   :  { %312 = vmatpush3.msra.mxu0 %v74_v6  ;;  %347 = vmatpush3.msra.mxu1 %v162_v12  ;;  %v151_v33 = vld [vmem:[#allocation8] sm:$0xff]  ;;  %v268_v37 = vld [vmem:[%s552_s3] ss:$0 sm:$0xff] }
  0x31   :  { %313 = vmatprep.subr.mxu0 %v472_v0  ;;  %348 = vmatprep.subr.mxu1 %v472_v0 }
  0x32   :  { %314 = vmatpush3.msra.mxu0 %v73_v9  ;;  %349 = vmatpush3.msra.mxu1 %v161_v14 }
  0x33   :  { %315 = vmatprep.subr.mxu0 %v472_v0  ;;  %350 = vmatprep.subr.mxu1 %v472_v0 }
  0x34   :  { %316 = vmatpush3.msra.mxu0 %v72_v11  ;;  %351 = vmatpush3.msra.mxu1 %v160_v16 }
  0x35   :  { %317 = vmatprep.subr.mxu0 %v472_v0  ;;  %352 = vmatprep.subr.mxu1 %v472_v0 }
  0x36   :  { %318 = vmatpush3.msra.mxu0 %v71_v13  ;;  %353 = vmatpush3.msra.mxu1 %v159_v18 }
  0x37   :  { %319 = vmatprep.subr.mxu0 %v472_v0  ;;  %354 = vmatprep.subr.mxu1 %v472_v0 }
  0x38   :  { %320 = vmatpush3.msra.mxu0 %v70_v15  ;;  %355 = vmatpush3.msra.mxu1 %v158_v20 }
  0x39   :  { %321 = vmatprep.subr.mxu0 %v472_v0  ;;  %356 = vmatprep.subr.mxu1 %v472_v0 }
  0x3a   :  { %322 = vmatpush3.msra.mxu0 %v69_v17  ;;  %357 = vmatpush3.msra.mxu1 %v157_v22 }
  0x3b   :  { %323 = vmatprep.subr.mxu0 %v472_v0  ;;  %358 = vmatprep.subr.mxu1 %v472_v0 }
  0x3c   :  { %324 = vmatpush3.msra.mxu0 %v68_v19  ;;  %359 = vmatpush3.msra.mxu1 %v156_v24 }
  0x3d   :  { %325 = vmatprep.subr.mxu0 %v472_v0  ;;  %360 = vmatprep.subr.mxu1 %v472_v0 }
  0x3e   :  { %326 = vmatpush3.msra.mxu0 %v67_v21  ;;  %361 = vmatpush3.msra.mxu1 %v155_v26 }
  0x3f   :  { %327 = vmatprep.subr.mxu0 %v472_v0  ;;  %362 = vmatprep.subr.mxu1 %v472_v0 }
  0x40   :  { %328 = vmatpush3.msra.mxu0 %v66_v23  ;;  %363 = vmatpush3.msra.mxu1 %v154_v28 }
  0x41   :  { %329 = vmatprep.subr.mxu0 %v472_v0  ;;  %364 = vmatprep.subr.mxu1 %v472_v0 }
  0x42   :  { %330 = vmatpush3.msra.mxu0 %v65_v25  ;;  %365 = vmatpush3.msra.mxu1 %v153_v31 }
  0x43   :  { %331 = vmatprep.subr.mxu0 %v472_v0  ;;  %366 = vmatprep.subr.mxu1 %v472_v0 }
  0x44   :  { %332 = vmatpush3.msra.mxu0 %v64_v27  ;;  %367 = vmatpush3.msra.mxu1 %v152_v32 }
  0x45   :  { %333 = vmatprep.subr.mxu0 %v472_v0  ;;  %368 = vmatprep.subr.mxu1 %v472_v0 }
  0x46   :  { %334 = vmatpush3.msra.mxu0 %v63_v29  ;;  %369 = vmatpush3.msra.mxu1 %v151_v33 }
  0x47   :  { %336 = vmatmul.mubr.f32.vlgmr.msra.gmra.mxu0 %v62_v30 }
 0x107   :  { %v145_v34 = vpop.f32.mrf.mxu0 }
 0x108   :  { %v149_v35 = vmax.f32 %v145_v34, 0.0 }
 0x109   :  { %v337_v36 = vpop.f32.mrf.mxu0 }
 0x10a   :  { %371 = vmatmul.mubr.f32.vlgmr.msra.gmra.mxu1 %v149_v35 }
 0x1ca   :  { %v233_v38 = vpop.f32.mrf.mxu1 }
 0x1cb   :  { %v250_v39 = vadd.f32 %v268_v37, %v233_v38 }
 0x1cc   :  { %v372_v40 = vpop.f32.mrf.mxu1 }
 0x1cd   :  { %251 = vst [vmem:[#allocation9] sm:$0xff] %v250_v39 }
 0x1ce   :  { %452 = shalt.err (!%p449_p5)
}
 0x1cf   :  { %261 = dma.vmem_to_hbm [thread:$0]  %s259_s6, 128, %s553_s4, [#allocation5]  }
 0x1d0   :  { %465 = dma.done.wait [#allocation5], 128  }
 0x1d1   :  { %466 = vsyncadd [#allocation5], 4294967168 }
 0x1d2   :  { %265 = vsyncpa [#allocation4], 1 }
 0x1d3   :  { %266 = vsyncpa [#allocation7], 1 }
 0x1d4   :  { %267 = vsyncpa [#allocation5], 1 }

// kernel: tpu_custom_call.1
= control target key start
LH: loop header
LB: loop body
LE: loop exit
PB: predicated region body
PF: predicated region fallthrough
CT: control target
= control target key end

     0   :  { %9 = vsyncpa [#allocation4], 0  ;;  %s549_s0 = inlined_call_operand.hbm [shape: f32[8,128], index: 0, kind: input, shape index: {}]   ;;  %s550_s1 = inlined_call_operand.hbm [shape: f32[128,128], index: 1, kind: input, shape index: {}]   ;;  %s551_s2 = inlined_call_operand.hbm [shape: f32[128,128], index: 2, kind: input, shape index: {}]   ;;  %s552_s3 = inlined_call_operand.vmem [shape: f32[1,128], index: 3, kind: input, shape index: {}]   ;;  %s553_s4 = inlined_call_operand.hbm [shape: f32[8,128], index: 4, kind: output, shape index: {}]  }
   0x1   :  { %10 = vsyncpa [#allocation7], 0 }
   0x2   :  { %11 = vsyncpa [#allocation5], 0  ;;  %s467_s15 = smov [#allocation6]  }
   0x3   :  { %s27_s16 = sshll.u32 %s467_s15, 4  ;;  %s28_s16 = int_to_ptr.vmem [resolvable:$true] %s27_s16 }
   0x4   :  { %s389_s17 = scalar_lea.vmem %s28_s16, 2048  ;;  %p394_p1 = scmp.lt.s32.totalorder %s28_s16, %s28_s16 }
   0x5   :  { %p390_p0 = scmp.ne.s32.totalorder %s28_s16, %s389_s17  ;;  %p395_p2 = scmp.lt.s32.totalorder %s389_s17, %s389_s17 }
   0x7   :  { %p396_p3 = por %p395_p2, %p394_p1 }
   0x9   :  { %p397_p4 = pnand %p396_p3, %p390_p0 }
   0xb   :  { %400 = shalt.err (!%p397_p4)
}
   0xc   :  { %s468_s18 = smov 128   ;;  %s469_s19 = smov 8  }
   0xd   :  { %33 = dma.hbm_to_vmem [thread:$0]  %s550_s1, 2048, %s28_s16, [#allocation7], %s468_s18, %s468_s18, %s469_s19  }
   0xe   :  { %s470_s22 = smov [#allocation3]   ;;  %s471_s24 = smov [#allocation8]  }
   0xf   :  { %s18_s23 = sshll.u32 %s470_s22, 4  ;;  %s39_s25 = sshll.u32 %s471_s24, 4  ;;  %s19_s23 = int_to_ptr.vmem [resolvable:$true] %s18_s23  ;;  %s40_s25 = int_to_ptr.vmem [resolvable:$true] %s39_s25 }
  0x10   :  { %s409_s26 = scalar_lea.vmem %s19_s23, 128  ;;  %p414_p6 = scmp.lt.s32.totalorder %s19_s23, %s19_s23 }
  0x11   :  { %p410_p5 = scmp.ne.s32.totalorder %s19_s23, %s409_s26  ;;  %p415_p7 = scmp.lt.s32.totalorder %s409_s26, %s409_s26 }
  0x13   :  { %p416_p8 = por %p415_p7, %p414_p6 }
  0x15   :  { %p417_p9 = pnand %p416_p8, %p410_p5 }
  0x17   :  { %420 = shalt.err (!%p417_p9)
}
  0x18   :  { %21 = dma.hbm_to_vmem [thread:$0]  %s549_s0, 128, %s19_s23, [#allocation4]  }
  0x19   :  { %s429_s29 = scalar_lea.vmem %s40_s25, 2048  ;;  %p434_p11 = scmp.lt.s32.totalorder %s40_s25, %s40_s25 }
  0x1a   :  { %p430_p10 = scmp.ne.s32.totalorder %s40_s25, %s429_s29  ;;  %p435_p12 = scmp.lt.s32.totalorder %s429_s29, %s429_s29 }
  0x1c   :  { %p436_p13 = por %p435_p12, %p434_p11 }
  0x1e   :  { %p437_p0 = pnand %p436_p13, %p430_p10 }
  0x20   :  { %440 = shalt.err (!%p437_p0)
}
  0x21   :  { %45 = dma.hbm_to_vmem [thread:$0]  %s551_s2, 2048, %s40_s25, [#allocation7], %s468_s18, %s468_s18, %s469_s19  }
  0x22   :  { %461 = dma.done.wait [#allocation4], 128  }
  0x23   :  { %462 = vsyncadd [#allocation4], 4294967168 }
  0x24   :  { %463 = dma.done.wait [#allocation7], 4096  }
  0x25   :  { %464 = vsyncadd [#allocation7], 4294963200  ;;  %v472_v0 = vmov 0.0   ;;  %vm473_vm0 = vmmov 0   ;;  %v78_v1 = vld [vmem:[#allocation6 + $0x78] sm:$0xff]  ;;  %v77_v2 = vld [vmem:[#allocation6 + $0x70] sm:$0xff] }
  0x26   :  { %303 = vmatprep.subr.mxu0 %v472_v0  ;;  %335 = vmatprep.mubr.msk.f32.mxu0 %vm473_vm0, %v472_v0  ;;  %v76_v3 = vld [vmem:[#allocation6 + $0x68] sm:$0xff]  ;;  %v75_v4 = vld [vmem:[#allocation6 + $0x60] sm:$0xff]  ;;  %v166_v5 = vld [vmem:[#allocation8 + $0x78] sm:$0xff]  ;;  %s474_s5 = smov [#allocation9]  }
  0x27   :  { %338 = vmatprep.subr.mxu1 %v472_v0  ;;  %370 = vmatprep.mubr.msk.f32.mxu1 %vm473_vm0, %v472_v0  ;;  %v74_v6 = vld [vmem:[#allocation6 + $0x58] sm:$0xff]  ;;  %v165_v7 = vld [vmem:[#allocation8 + $0x70] sm:$0xff]  ;;  %v164_v8 = vld [vmem:[#allocation8 + $0x68] sm:$0xff]  ;;  %s258_s6 = sshll.u32 %s474_s5, 4  ;;  %s259_s6 = int_to_ptr.vmem [resolvable:$true] %s258_s6 }
  0x28   :  { %304 = vmatpush3.msra.mxu0 %v78_v1  ;;  %339 = vmatpush3.msra.mxu1 %v166_v5  ;;  %v73_v9 = vld [vmem:[#allocation6 + $0x50] sm:$0xff]  ;;  %v163_v10 = vld [vmem:[#allocation8 + $0x60] sm:$0xff]  ;;  %v72_v11 = vld [vmem:[#allocation6 + $0x48] sm:$0xff]  ;;  %s441_s7 = scalar_lea.vmem %s259_s6, 128  ;;  %p446_p2 = scmp.lt.s32.totalorder %s259_s6, %s259_s6 }
  0x29   :  { %305 = vmatprep.subr.mxu0 %v472_v0  ;;  %340 = vmatprep.subr.mxu1 %v472_v0  ;;  %v162_v12 = vld [vmem:[#allocation8 + $0x58] sm:$0xff]  ;;  %v71_v13 = vld [vmem:[#allocation6 + $0x40] sm:$0xff]  ;;  %v161_v14 = vld [vmem:[#allocation8 + $0x50] sm:$0xff]  ;;  %p442_p1 = scmp.ne.s32.totalorder %s259_s6, %s441_s7  ;;  %p447_p3 = scmp.lt.s32.totalorder %s441_s7, %s441_s7 }
  0x2a   :  { %306 = vmatpush3.msra.mxu0 %v77_v2  ;;  %341 = vmatpush3.msra.mxu1 %v165_v7  ;;  %v70_v15 = vld [vmem:[#allocation6 + $0x38] sm:$0xff]  ;;  %v160_v16 = vld [vmem:[#allocation8 + $0x48] sm:$0xff]  ;;  %v69_v17 = vld [vmem:[#allocation6 + $0x30] sm:$0xff] }
  0x2b   :  { %307 = vmatprep.subr.mxu0 %v472_v0  ;;  %342 = vmatprep.subr.mxu1 %v472_v0  ;;  %v159_v18 = vld [vmem:[#allocation8 + $0x40] sm:$0xff]  ;;  %v68_v19 = vld [vmem:[#allocation6 + $0x28] sm:$0xff]  ;;  %v158_v20 = vld [vmem:[#allocation8 + $0x38] sm:$0xff]  ;;  %p448_p4 = por %p447_p3, %p446_p2 }
  0x2c   :  { %308 = vmatpush3.msra.mxu0 %v76_v3  ;;  %343 = vmatpush3.msra.mxu1 %v164_v8  ;;  %v67_v21 = vld [vmem:[#allocation6 + $0x20] sm:$0xff]  ;;  %v157_v22 = vld [vmem:[#allocation8 + $0x30] sm:$0xff]  ;;  %v66_v23 = vld [vmem:[#allocation6 + $0x18] sm:$0xff] }
  0x2d   :  { %309 = vmatprep.subr.mxu0 %v472_v0  ;;  %344 = vmatprep.subr.mxu1 %v472_v0  ;;  %v156_v24 = vld [vmem:[#allocation8 + $0x28] sm:$0xff]  ;;  %v65_v25 = vld [vmem:[#allocation6 + $0x10] sm:$0xff]  ;;  %v155_v26 = vld [vmem:[#allocation8 + $0x20] sm:$0xff]  ;;  %p449_p5 = pnand %p448_p4, %p442_p1 }
  0x2e   :  { %310 = vmatpush3.msra.mxu0 %v75_v4  ;;  %345 = vmatpush3.msra.mxu1 %v163_v10  ;;  %v64_v27 = vld [vmem:[#allocation6 + $0x8] sm:$0xff]  ;;  %v154_v28 = vld [vmem:[#allocation8 + $0x18] sm:$0xff]  ;;  %v63_v29 = vld [vmem:[#allocation6] sm:$0xff] }
  0x2f   :  { %311 = vmatprep.subr.mxu0 %v472_v0  ;;  %346 = vmatprep.subr.mxu1 %v472_v0  ;;  %v62_v30 = vld [vmem:[#allocation3] sm:$0xff]  ;;  %v153_v31 = vld [vmem:[#allocation8 + $0x10] sm:$0xff]  ;;  %v152_v32 = vld [vmem:[#allocation8 + $0x8] sm:$0xff] }
  0x30   :  { %312 = vmatpush3.msra.mxu0 %v74_v6  ;;  %347 = vmatpush3.msra.mxu1 %v162_v12  ;;  %v151_v33 = vld [vmem:[#allocation8] sm:$0xff]  ;;  %v268_v37 = vld [vmem:[%s552_s3] ss:$0 sm:$0xff] }
  0x31   :  { %313 = vmatprep.subr.mxu0 %v472_v0  ;;  %348 = vmatprep.subr.mxu1 %v472_v0 }
  0x32   :  { %314 = vmatpush3.msra.mxu0 %v73_v9  ;;  %349 = vmatpush3.msra.mxu1 %v161_v14 }
  0x33   :  { %315 = vmatprep.subr.mxu0 %v472_v0  ;;  %350 = vmatprep.subr.mxu1 %v472_v0 }
  0x34   :  { %316 = vmatpush3.msra.mxu0 %v72_v11  ;;  %351 = vmatpush3.msra.mxu1 %v160_v16 }
  0x35   :  { %317 = vmatprep.subr.mxu0 %v472_v0  ;;  %352 = vmatprep.subr.mxu1 %v472_v0 }
  0x36   :  { %318 = vmatpush3.msra.mxu0 %v71_v13  ;;  %353 = vmatpush3.msra.mxu1 %v159_v18 }
  0x37   :  { %319 = vmatprep.subr.mxu0 %v472_v0  ;;  %354 = vmatprep.subr.mxu1 %v472_v0 }
  0x38   :  { %320 = vmatpush3.msra.mxu0 %v70_v15  ;;  %355 = vmatpush3.msra.mxu1 %v158_v20 }
  0x39   :  { %321 = vmatprep.subr.mxu0 %v472_v0  ;;  %356 = vmatprep.subr.mxu1 %v472_v0 }
  0x3a   :  { %322 = vmatpush3.msra.mxu0 %v69_v17  ;;  %357 = vmatpush3.msra.mxu1 %v157_v22 }
  0x3b   :  { %323 = vmatprep.subr.mxu0 %v472_v0  ;;  %358 = vmatprep.subr.mxu1 %v472_v0 }
  0x3c   :  { %324 = vmatpush3.msra.mxu0 %v68_v19  ;;  %359 = vmatpush3.msra.mxu1 %v156_v24 }
  0x3d   :  { %325 = vmatprep.subr.mxu0 %v472_v0  ;;  %360 = vmatprep.subr.mxu1 %v472_v0 }
  0x3e   :  { %326 = vmatpush3.msra.mxu0 %v67_v21  ;;  %361 = vmatpush3.msra.mxu1 %v155_v26 }
  0x3f   :  { %327 = vmatprep.subr.mxu0 %v472_v0  ;;  %362 = vmatprep.subr.mxu1 %v472_v0 }
  0x40   :  { %328 = vmatpush3.msra.mxu0 %v66_v23  ;;  %363 = vmatpush3.msra.mxu1 %v154_v28 }
  0x41   :  { %329 = vmatprep.subr.mxu0 %v472_v0  ;;  %364 = vmatprep.subr.mxu1 %v472_v0 }
  0x42   :  { %330 = vmatpush3.msra.mxu0 %v65_v25  ;;  %365 = vmatpush3.msra.mxu1 %v153_v31 }
  0x43   :  { %331 = vmatprep.subr.mxu0 %v472_v0  ;;  %366 = vmatprep.subr.mxu1 %v472_v0 }
  0x44   :  { %332 = vmatpush3.msra.mxu0 %v64_v27  ;;  %367 = vmatpush3.msra.mxu1 %v152_v32 }
  0x45   :  { %333 = vmatprep.subr.mxu0 %v472_v0  ;;  %368 = vmatprep.subr.mxu1 %v472_v0 }
  0x46   :  { %334 = vmatpush3.msra.mxu0 %v63_v29  ;;  %369 = vmatpush3.msra.mxu1 %v151_v33 }
  0x47   :  { %336 = vmatmul.mubr.f32.vlgmr.msra.gmra.mxu0 %v62_v30 }
 0x107   :  { %v145_v34 = vpop.f32.mrf.mxu0 }
 0x108   :  { %v149_v35 = vmax.f32 %v145_v34, 0.0 }
 0x109   :  { %v337_v36 = vpop.f32.mrf.mxu0 }
 0x10a   :  { %371 = vmatmul.mubr.f32.vlgmr.msra.gmra.mxu1 %v149_v35 }
 0x1ca   :  { %v233_v38 = vpop.f32.mrf.mxu1 }
 0x1cb   :  { %v250_v39 = vadd.f32 %v268_v37, %v233_v38 }
 0x1cc   :  { %v372_v40 = vpop.f32.mrf.mxu1 }
 0x1cd   :  { %251 = vst [vmem:[#allocation9] sm:$0xff] %v250_v39 }
 0x1ce   :  { %452 = shalt.err (!%p449_p5)
}
 0x1cf   :  { %261 = dma.vmem_to_hbm [thread:$0]  %s259_s6, 128, %s553_s4, [#allocation5]  }
 0x1d0   :  { %465 = dma.done.wait [#allocation5], 128  }
 0x1d1   :  { %466 = vsyncadd [#allocation5], 4294967168 }
 0x1d2   :  { %265 = vsyncpa [#allocation4], 1 }
 0x1d3   :  { %266 = vsyncpa [#allocation7], 1 }
 0x1d4   :  { %267 = vsyncpa [#allocation5], 1 }

</bundles_post_ra>
